<compile_context>
chip_gen: v5e
topology: v5e:2x2
jax: 0.10.0
libtpu: 0.0.40
codegen_flags: <defaults>
</compile_context>

<pallas_src>
import functools

import jax
import jax.numpy as jnp
from jax.experimental import pallas as pl
from jax.experimental.pallas import tpu as pltpu

_LANE = 128
_SUBLANE = 8


def _round_up(x, m):
    return ((x + m - 1) // m) * m


# ------------------------------ kernel ------------------------------

def _cheb_apply(s_bf16, x_bf16, w_ref, chunk, k_order):
    """Interleaved Chebyshev conv: acc = sum_k T_k @ W[k]  (W[k] = w_ref rows k*chunk:(k+1)*chunk).

    T_0 = x, T_1 = S@x, T_k = 2 S T_{k-1} - T_{k-2}.
    bf16 operands into every jnp.dot, f32 accumulation and f32 recursion state.
    k_order / chunk are static Python ints -> fully unrolled at trace time.
    """
    bf16 = jnp.bfloat16
    acc = jnp.dot(x_bf16, w_ref[0:chunk, :], preferred_element_type=jnp.float32)
    if k_order > 1:
        t_prev = x_bf16.astype(jnp.float32)
        t_cur = jnp.dot(s_bf16, x_bf16, preferred_element_type=jnp.float32)
        acc = acc + jnp.dot(t_cur.astype(bf16), w_ref[chunk:2 * chunk, :],
                            preferred_element_type=jnp.float32)
        for k in range(2, k_order):
            t_new = 2.0 * jnp.dot(s_bf16, t_cur.astype(bf16),
                                  preferred_element_type=jnp.float32) - t_prev
            acc = acc + jnp.dot(t_new.astype(bf16), w_ref[k * chunk:(k + 1) * chunk, :],
                                preferred_element_type=jnp.float32)
            t_prev, t_cur = t_cur, t_new
    return acc


def _kipfnet_kernel(s_ref, x_ref, w1_ref, b1_ref, w2_ref, b2_ref, o_ref, *, k1, k2, fp, hp):
    s = s_ref[...]                                                     # bf16 [Np, Np]

    # ---- Kipfblock1: ChebConv(K=k1) + bias, fused ReLU ----
    h = _cheb_apply(s, x_ref[...], w1_ref, fp, k1) + b1_ref[...]       # f32 [Np, Hp]
    h = jnp.maximum(h, 0.0)
    # TODO(synk): F.dropout(p=0.5) is identity in eval mode; training-mode RNG dropout not implemented.

    # ---- conv_mix: ChebConv(K=k2) + bias (inout_skipconn=False, module default) ----
    o_ref[...] = _cheb_apply(s, h.astype(jnp.bfloat16), w2_ref, hp, k2) + b2_ref[...]


# ------------------------------ wrapper ------------------------------

def prepare_kipfnet(params, S):
    """Hoisted, per-graph/per-params preprocessing: padding, bf16 casting, weight flattening."""
    N = S.shape[0]
    K1, Fin, H = params["W1"].shape
    K2, _, C = params["W2"].shape

    Np = _round_up(N, _SUBLANE)
    Fp = _round_up(Fin, _LANE)
    Hp = _round_up(H, _LANE)
    Cp = _round_up(C, _LANE)

    # Zero padding is inert: S padded rows/cols are zero, padded bias lanes are zero
    # -> padded h lanes are zero and padded rows never contaminate real rows.
    S_p = jnp.zeros((Np, Np), jnp.float32).at[:N, :N].set(S).astype(jnp.bfloat16)
    W1_p = jnp.zeros((K1, Fp, Hp), jnp.float32).at[:, :Fin, :H].set(params["W1"])
    W2_p = jnp.zeros((K2, Hp, Cp), jnp.float32).at[:, :H, :C].set(params["W2"])
    b1_p = jnp.zeros((1, Hp), jnp.float32).at[:, :H].set(params["b1"])
    b2_p = jnp.zeros((1, Cp), jnp.float32).at[:, :C].set(params["b2"])

    # Flatten stacked Chebyshev weights: rows [k*Fp:(k+1)*Fp] of W1_flat are W1[k].
    W1_flat = W1_p.reshape(K1 * Fp, Hp).astype(jnp.bfloat16)
    W2_flat = W2_p.reshape(K2 * Hp, Cp).astype(jnp.bfloat16)

    return dict(S_p=S_p, W1_flat=W1_flat, b1_p=b1_p, W2_flat=W2_flat, b2_p=b2_p,
                N=N, Fin=Fin, C=C, K1=K1, K2=K2, Np=Np, Fp=Fp, Hp=Hp, Cp=Cp)


def kipfnet_pallas(prep, x):
    """Fused KipfNet forward. x: [N, Fin] f32. Returns [N, num_classes] f32."""
    N, Fin, C = prep["N"], prep["Fin"], prep["C"]
    K1, K2 = prep["K1"], prep["K2"]
    Np, Fp, Hp, Cp = prep["Np"], prep["Fp"], prep["Hp"], prep["Cp"]

    x_p = jnp.zeros((Np, Fp), jnp.float32).at[:N, :Fin].set(x).astype(jnp.bfloat16)

    # VMEM budget: resident operands + f32 intermediates, with headroom.
    resident = (Np * Np * 2 + Np * Fp * 2                       # S, x (bf16)
                + K1 * Fp * Hp * 2 + K2 * Hp * Cp * 2           # weights (bf16)
                + (Hp + Cp) * 4                                 # biases
                + Np * Cp * 4                                   # out
                + 5 * Np * max(Fp, Hp) * 4)                     # t_prev/t_cur/t_new/acc/h (f32)
    vmem_limit = int(min(max(2 * resident, 32 * 1024 * 1024), 100 * 1024 * 1024))

    flops = (2 * Np * Np * Fp * max(K1 - 1, 0) + 2 * Np * Fp * Hp * K1
             + 2 * Np * Np * Hp * max(K2 - 1, 0) + 2 * Np * Hp * Cp * K2)
    bytes_accessed = (Np * Np * 2 + Np * Fp * 2 + K1 * Fp * Hp * 2 + K2 * Hp * Cp * 2
                      + (Hp + Cp) * 4 + Np * Cp * 4)

    kernel = functools.partial(_kipfnet_kernel, k1=K1, k2=K2, fp=Fp, hp=Hp)
    vmem_spec = lambda: pl.BlockSpec(memory_space=pltpu.MemorySpace.VMEM)

    out_p = pl.pallas_call(
        kernel,
        out_shape=jax.ShapeDtypeStruct((Np, Cp), jnp.float32),
        in_specs=[vmem_spec() for _ in range(6)],
        out_specs=vmem_spec(),
        compiler_params=pltpu.CompilerParams(vmem_limit_bytes=vmem_limit),
        cost_estimate=pl.CostEstimate(flops=flops, transcendentals=0,
                                      bytes_accessed=bytes_accessed),
    )(prep["S_p"], x_p, prep["W1_flat"], prep["b1_p"], prep["W2_flat"], prep["b2_p"])

    return out_p[:N, :C]


# ------------------------------ graph / params utils ------------------------------

def build_scaled_laplacian(edge_index, num_nodes):
    """Dense 2L/lambda_max - I with lambda_max=2, sym norm (PyG ChebConv default):
    S = -(D^-1/2 A D^-1/2), zero diagonal."""
    row, col = edge_index
    A = jnp.zeros((num_nodes, num_nodes), jnp.float32)
    A = A.at[row, col].set(1.0)
    A = A * (1.0 - jnp.eye(num_nodes, dtype=jnp.float32))  # remove self loops
    deg = A.sum(axis=1)
    dinv = jnp.where(deg > 0, 1.0 / jnp.sqrt(deg), 0.0)
    return -(dinv[:, None] * A * dinv[None, :])


def glorot(key, shape):
    fan_in, fan_out = shape[-2], shape[-1]
    limit = jnp.sqrt(6.0 / (fan_in + fan_out))
    return jax.random.uniform(key, shape, jnp.float32, -limit, limit)


def init_kipfnet_params(key, num_features, num_classes, nh1=32, K=8, K_mix=2):
    k1, k2, k3, k4 = jax.random.split(key, 4)
    return {
        "W1": glorot(k1, (K, num_features, nh1)),
        "b1": 0.01 * jax.random.normal(k2, (1, nh1), jnp.float32),
        "W2": glorot(k3, (K_mix, nh1, num_classes)),
        "b2": 0.01 * jax.random.normal(k4, (1, num_classes), jnp.float32),
    }


# ------------------------- pure-JAX references -------------------------

def cheb_conv_ref(S, X, W, b):
    """Full-f32 reference (matches the PyTorch module math exactly)."""
    K = W.shape[0]
    t_prev, t_cur = X, X
    out = X @ W[0] + b
    if K > 1:
        t_cur = S @ X
        out = out + t_cur @ W[1]
    for k in range(2, K):
        t_new = 2.0 * (S @ t_cur) - t_prev
        out = out + t_new @ W[k]
        t_prev, t_cur = t_cur, t_new
    return out


def kipfnet_ref(params, x, S):
    h = jnp.maximum(cheb_conv_ref(S, x, params["W1"], params["b1"]), 0.0)
    return cheb_conv_ref(S, h, params["W2"], params["b2"])


def cheb_conv_ref_bf16(S_bf, X_bf, W_bf, b):
    """Emulates the kernel's mixed precision (bf16 dot operands, f32 accumulation/state)."""
    bf16 = jnp.bfloat16
    K = W_bf.shape[0]
    acc = jnp.dot(X_bf, W_bf[0], preferred_element_type=jnp.float32)
    if K > 1:
        t_prev = X_bf.astype(jnp.float32)
        t_cur = jnp.dot(S_bf, X_bf, preferred_element_type=jnp.float32)
        acc = acc + jnp.dot(t_cur.astype(bf16), W_bf[1], preferred_element_type=jnp.float32)
        for k in range(2, K):
            t_new = 2.0 * jnp.dot(S_bf, t_cur.astype(bf16),
                                  preferred_element_type=jnp.float32) - t_prev
            acc = acc + jnp.dot(t_new.astype(bf16), W_bf[k], preferred_element_type=jnp.float32)
            t_prev, t_cur = t_cur, t_new
    return acc + b


def kipfnet_ref_bf16(params, x, S):
    bf16 = jnp.bfloat16
    S_bf = S.astype(bf16)
    h = jnp.maximum(
        cheb_conv_ref_bf16(S_bf, x.astype(bf16), params["W1"].astype(bf16), params["b1"]), 0.0)
    return cheb_conv_ref_bf16(S_bf, h.astype(bf16), params["W2"].astype(bf16), params["b2"])


if __name__ == "__main__":
    N = 16            # nodes
    num_features = 4
    num_classes = 4
    nh1 = 32
    K, K_mix = 8, 2

    key = jax.random.PRNGKey(0)
    kx, kp = jax.random.split(key, 2)

    # node features
    x = jax.random.normal(kx, (N, num_features), jnp.float32)

    # deterministic undirected graph: ring + a few chords, both edge directions
    src = list(range(N)) + [0, 3, 5, 7]
    dst = [(i + 1) % N for i in range(N)] + [8, 11, 13, 2]
    row = jnp.array(src + dst, jnp.int32)
    col = jnp.array(dst + src, jnp.int32)
    edge_index = jnp.stack([row, col])

    S = build_scaled_laplacian(edge_index, N)
    params = init_kipfnet_params(kp, num_features, num_classes, nh1=nh1, K=K, K_mix=K_mix)

    prep = prepare_kipfnet(params, S)          # hoisted per-graph/per-params work
    out = kipfnet_pallas(prep, x)
    out = jax.block_until_ready(out)

    assert out.shape == (N, num_classes)

    # Tight check against a reference that emulates the kernel's mixed precision.
    ref_mixed = kipfnet_ref_bf16(params, x, S)
    assert jnp.allclose(out, ref_mixed, atol=2e-3, rtol=2e-3), "mismatch vs mixed-precision reference"

    # Loose sanity check against the full-f32 reference (bf16 operand quantization error only).
    ref_f32 = kipfnet_ref(params, x, S)
    assert jnp.allclose(out, ref_f32, atol=1e-1, rtol=1e-1), "mismatch vs f32 reference"

    print("KERNEL_OK")
</pallas_src>

<mosaic_0001>
module attributes {stable_mosaic.version = 11 : i64} {
  func.func @_kipfnet_kernel(%arg0: memref<16x16xbf16, #tpu.memory_space<vmem>>, %arg1: memref<16x128xbf16, #tpu.memory_space<vmem>>, %arg2: memref<1024x128xbf16, #tpu.memory_space<vmem>>, %arg3: memref<1x128xf32, #tpu.memory_space<vmem>>, %arg4: memref<256x128xbf16, #tpu.memory_space<vmem>>, %arg5: memref<1x128xf32, #tpu.memory_space<vmem>>, %arg6: memref<16x128xf32, #tpu.memory_space<vmem>>) attributes {dimension_semantics = [], scalar_prefetch = 0 : i64, scratch_operands = 0 : i64, tpu.core_type = #tpu.core_type<tc>} {
    %c0 = arith.constant 0 : index
    %c0_0 = arith.constant 0 : index
    %0 = vector.load %arg0[%c0, %c0_0] : memref<16x16xbf16, #tpu.memory_space<vmem>>, vector<16x16xbf16>
    %c0_1 = arith.constant 0 : index
    %c0_2 = arith.constant 0 : index
    %1 = vector.load %arg1[%c0_1, %c0_2] : memref<16x128xbf16, #tpu.memory_space<vmem>>, vector<16x128xbf16>
    %c0_3 = arith.constant 0 : index
    %c0_4 = arith.constant 0 : index
    %2 = vector.load %arg2[%c0_3, %c0_4] : memref<1024x128xbf16, #tpu.memory_space<vmem>>, vector<128x128xbf16>
    %cst = arith.constant dense<0.000000e+00> : vector<16x128xf32>
    %3 = tpu.matmul %1, %2, %cst {dimension_numbers = #tpu.dot_dimension_numbers<[1], [0], [0], [1], [0, 0, 1, 1], [], []>} : vector<16x128xbf16>, vector<128x128xbf16>, vector<16x128xf32> -> vector<16x128xf32>
    %4 = arith.extf %1 : vector<16x128xbf16> to vector<16x128xf32>
    %cst_5 = arith.constant dense<0.000000e+00> : vector<16x128xf32>
    %5 = tpu.matmul %0, %1, %cst_5 {dimension_numbers = #tpu.dot_dimension_numbers<[1], [0], [0], [1], [0, 0, 1, 1], [], []>} : vector<16x16xbf16>, vector<16x128xbf16>, vector<16x128xf32> -> vector<16x128xf32>
    %6 = arith.truncf %5 : vector<16x128xf32> to vector<16x128xbf16>
    %c128 = arith.constant 128 : index
    %c0_6 = arith.constant 0 : index
    %7 = vector.load %arg2[%c128, %c0_6] : memref<1024x128xbf16, #tpu.memory_space<vmem>>, vector<128x128xbf16>
    %cst_7 = arith.constant dense<0.000000e+00> : vector<16x128xf32>
    %8 = tpu.matmul %6, %7, %cst_7 {dimension_numbers = #tpu.dot_dimension_numbers<[1], [0], [0], [1], [0, 0, 1, 1], [], []>} : vector<16x128xbf16>, vector<128x128xbf16>, vector<16x128xf32> -> vector<16x128xf32>
    %9 = arith.addf %3, %8 : vector<16x128xf32>
    %10 = arith.truncf %5 : vector<16x128xf32> to vector<16x128xbf16>
    %cst_8 = arith.constant dense<0.000000e+00> : vector<16x128xf32>
    %11 = tpu.matmul %0, %10, %cst_8 {dimension_numbers = #tpu.dot_dimension_numbers<[1], [0], [0], [1], [0, 0, 1, 1], [], []>} : vector<16x16xbf16>, vector<16x128xbf16>, vector<16x128xf32> -> vector<16x128xf32>
    %cst_9 = arith.constant 2.000000e+00 : f32
    %12 = vector.broadcast %cst_9 : f32 to vector<16x128xf32>
    %13 = arith.mulf %12, %11 : vector<16x128xf32>
    %14 = arith.subf %13, %4 : vector<16x128xf32>
    %15 = arith.truncf %14 : vector<16x128xf32> to vector<16x128xbf16>
    %c256 = arith.constant 256 : index
    %c0_10 = arith.constant 0 : index
    %16 = vector.load %arg2[%c256, %c0_10] : memref<1024x128xbf16, #tpu.memory_space<vmem>>, vector<128x128xbf16>
    %cst_11 = arith.constant dense<0.000000e+00> : vector<16x128xf32>
    %17 = tpu.matmul %15, %16, %cst_11 {dimension_numbers = #tpu.dot_dimension_numbers<[1], [0], [0], [1], [0, 0, 1, 1], [], []>} : vector<16x128xbf16>, vector<128x128xbf16>, vector<16x128xf32> -> vector<16x128xf32>
    %18 = arith.addf %9, %17 : vector<16x128xf32>
    %19 = arith.truncf %14 : vector<16x128xf32> to vector<16x128xbf16>
    %cst_12 = arith.constant dense<0.000000e+00> : vector<16x128xf32>
    %20 = tpu.matmul %0, %19, %cst_12 {dimension_numbers = #tpu.dot_dimension_numbers<[1], [0], [0], [1], [0, 0, 1, 1], [], []>} : vector<16x16xbf16>, vector<16x128xbf16>, vector<16x128xf32> -> vector<16x128xf32>
    %cst_13 = arith.constant 2.000000e+00 : f32
    %21 = vector.broadcast %cst_13 : f32 to vector<16x128xf32>
    %22 = arith.mulf %21, %20 : vector<16x128xf32>
    %23 = arith.subf %22, %5 : vector<16x128xf32>
    %24 = arith.truncf %23 : vector<16x128xf32> to vector<16x128xbf16>
    %c384 = arith.constant 384 : index
    %c0_14 = arith.constant 0 : index
    %25 = vector.load %arg2[%c384, %c0_14] : memref<1024x128xbf16, #tpu.memory_space<vmem>>, vector<128x128xbf16>
    %cst_15 = arith.constant dense<0.000000e+00> : vector<16x128xf32>
    %26 = tpu.matmul %24, %25, %cst_15 {dimension_numbers = #tpu.dot_dimension_numbers<[1], [0], [0], [1], [0, 0, 1, 1], [], []>} : vector<16x128xbf16>, vector<128x128xbf16>, vector<16x128xf32> -> vector<16x128xf32>
    %27 = arith.addf %18, %26 : vector<16x128xf32>
    %28 = arith.truncf %23 : vector<16x128xf32> to vector<16x128xbf16>
    %cst_16 = arith.constant dense<0.000000e+00> : vector<16x128xf32>
    %29 = tpu.matmul %0, %28, %cst_16 {dimension_numbers = #tpu.dot_dimension_numbers<[1], [0], [0], [1], [0, 0, 1, 1], [], []>} : vector<16x16xbf16>, vector<16x128xbf16>, vector<16x128xf32> -> vector<16x128xf32>
    %cst_17 = arith.constant 2.000000e+00 : f32
    %30 = vector.broadcast %cst_17 : f32 to vector<16x128xf32>
    %31 = arith.mulf %30, %29 : vector<16x128xf32>
    %32 = arith.subf %31, %14 : vector<16x128xf32>
    %33 = arith.truncf %32 : vector<16x128xf32> to vector<16x128xbf16>
    %c512 = arith.constant 512 : index
    %c0_18 = arith.constant 0 : index
    %34 = vector.load %arg2[%c512, %c0_18] : memref<1024x128xbf16, #tpu.memory_space<vmem>>, vector<128x128xbf16>
    %cst_19 = arith.constant dense<0.000000e+00> : vector<16x128xf32>
    %35 = tpu.matmul %33, %34, %cst_19 {dimension_numbers = #tpu.dot_dimension_numbers<[1], [0], [0], [1], [0, 0, 1, 1], [], []>} : vector<16x128xbf16>, vector<128x128xbf16>, vector<16x128xf32> -> vector<16x128xf32>
    %36 = arith.addf %27, %35 : vector<16x128xf32>
    %37 = arith.truncf %32 : vector<16x128xf32> to vector<16x128xbf16>
    %cst_20 = arith.constant dense<0.000000e+00> : vector<16x128xf32>
    %38 = tpu.matmul %0, %37, %cst_20 {dimension_numbers = #tpu.dot_dimension_numbers<[1], [0], [0], [1], [0, 0, 1, 1], [], []>} : vector<16x16xbf16>, vector<16x128xbf16>, vector<16x128xf32> -> vector<16x128xf32>
    %cst_21 = arith.constant 2.000000e+00 : f32
    %39 = vector.broadcast %cst_21 : f32 to vector<16x128xf32>
    %40 = arith.mulf %39, %38 : vector<16x128xf32>
    %41 = arith.subf %40, %23 : vector<16x128xf32>
    %42 = arith.truncf %41 : vector<16x128xf32> to vector<16x128xbf16>
    %c640 = arith.constant 640 : index
    %c0_22 = arith.constant 0 : index
    %43 = vector.load %arg2[%c640, %c0_22] : memref<1024x128xbf16, #tpu.memory_space<vmem>>, vector<128x128xbf16>
    %cst_23 = arith.constant dense<0.000000e+00> : vector<16x128xf32>
    %44 = tpu.matmul %42, %43, %cst_23 {dimension_numbers = #tpu.dot_dimension_numbers<[1], [0], [0], [1], [0, 0, 1, 1], [], []>} : vector<16x128xbf16>, vector<128x128xbf16>, vector<16x128xf32> -> vector<16x128xf32>
    %45 = arith.addf %36, %44 : vector<16x128xf32>
    %46 = arith.truncf %41 : vector<16x128xf32> to vector<16x128xbf16>
    %cst_24 = arith.constant dense<0.000000e+00> : vector<16x128xf32>
    %47 = tpu.matmul %0, %46, %cst_24 {dimension_numbers = #tpu.dot_dimension_numbers<[1], [0], [0], [1], [0, 0, 1, 1], [], []>} : vector<16x16xbf16>, vector<16x128xbf16>, vector<16x128xf32> -> vector<16x128xf32>
    %cst_25 = arith.constant 2.000000e+00 : f32
    %48 = vector.broadcast %cst_25 : f32 to vector<16x128xf32>
    %49 = arith.mulf %48, %47 : vector<16x128xf32>
    %50 = arith.subf %49, %32 : vector<16x128xf32>
    %51 = arith.truncf %50 : vector<16x128xf32> to vector<16x128xbf16>
    %c768 = arith.constant 768 : index
    %c0_26 = arith.constant 0 : index
    %52 = vector.load %arg2[%c768, %c0_26] : memref<1024x128xbf16, #tpu.memory_space<vmem>>, vector<128x128xbf16>
    %cst_27 = arith.constant dense<0.000000e+00> : vector<16x128xf32>
    %53 = tpu.matmul %51, %52, %cst_27 {dimension_numbers = #tpu.dot_dimension_numbers<[1], [0], [0], [1], [0, 0, 1, 1], [], []>} : vector<16x128xbf16>, vector<128x128xbf16>, vector<16x128xf32> -> vector<16x128xf32>
    %54 = arith.addf %45, %53 : vector<16x128xf32>
    %55 = arith.truncf %50 : vector<16x128xf32> to vector<16x128xbf16>
    %cst_28 = arith.constant dense<0.000000e+00> : vector<16x128xf32>
    %56 = tpu.matmul %0, %55, %cst_28 {dimension_numbers = #tpu.dot_dimension_numbers<[1], [0], [0], [1], [0, 0, 1, 1], [], []>} : vector<16x16xbf16>, vector<16x128xbf16>, vector<16x128xf32> -> vector<16x128xf32>
    %cst_29 = arith.constant 2.000000e+00 : f32
    %57 = vector.broadcast %cst_29 : f32 to vector<16x128xf32>
    %58 = arith.mulf %57, %56 : vector<16x128xf32>
    %59 = arith.subf %58, %41 : vector<16x128xf32>
    %60 = arith.truncf %59 : vector<16x128xf32> to vector<16x128xbf16>
    %c896 = arith.constant 896 : index
    %c0_30 = arith.constant 0 : index
    %61 = vector.load %arg2[%c896, %c0_30] : memref<1024x128xbf16, #tpu.memory_space<vmem>>, vector<128x128xbf16>
    %cst_31 = arith.constant dense<0.000000e+00> : vector<16x128xf32>
    %62 = tpu.matmul %60, %61, %cst_31 {dimension_numbers = #tpu.dot_dimension_numbers<[1], [0], [0], [1], [0, 0, 1, 1], [], []>} : vector<16x128xbf16>, vector<128x128xbf16>, vector<16x128xf32> -> vector<16x128xf32>
    %63 = arith.addf %54, %62 : vector<16x128xf32>
    %c0_32 = arith.constant 0 : index
    %c0_33 = arith.constant 0 : index
    %64 = vector.load %arg3[%c0_32, %c0_33] : memref<1x128xf32, #tpu.memory_space<vmem>>, vector<1x128xf32>
    %65 = vector.broadcast %64 : vector<1x128xf32> to vector<16x128xf32>
    %66 = arith.addf %63, %65 : vector<16x128xf32>
    %cst_34 = arith.constant 0.000000e+00 : f32
    %67 = vector.broadcast %cst_34 : f32 to vector<16x128xf32>
    %68 = arith.maximumf %66, %67 : vector<16x128xf32>
    %69 = arith.truncf %68 : vector<16x128xf32> to vector<16x128xbf16>
    %c0_35 = arith.constant 0 : index
    %c0_36 = arith.constant 0 : index
    %70 = vector.load %arg4[%c0_35, %c0_36] : memref<256x128xbf16, #tpu.memory_space<vmem>>, vector<128x128xbf16>
    %cst_37 = arith.constant dense<0.000000e+00> : vector<16x128xf32>
    %71 = tpu.matmul %69, %70, %cst_37 {dimension_numbers = #tpu.dot_dimension_numbers<[1], [0], [0], [1], [0, 0, 1, 1], [], []>} : vector<16x128xbf16>, vector<128x128xbf16>, vector<16x128xf32> -> vector<16x128xf32>
    %cst_38 = arith.constant dense<0.000000e+00> : vector<16x128xf32>
    %72 = tpu.matmul %0, %69, %cst_38 {dimension_numbers = #tpu.dot_dimension_numbers<[1], [0], [0], [1], [0, 0, 1, 1], [], []>} : vector<16x16xbf16>, vector<16x128xbf16>, vector<16x128xf32> -> vector<16x128xf32>
    %73 = arith.truncf %72 : vector<16x128xf32> to vector<16x128xbf16>
    %c128_39 = arith.constant 128 : index
    %c0_40 = arith.constant 0 : index
    %74 = vector.load %arg4[%c128_39, %c0_40] : memref<256x128xbf16, #tpu.memory_space<vmem>>, vector<128x128xbf16>
    %cst_41 = arith.constant dense<0.000000e+00> : vector<16x128xf32>
    %75 = tpu.matmul %73, %74, %cst_41 {dimension_numbers = #tpu.dot_dimension_numbers<[1], [0], [0], [1], [0, 0, 1, 1], [], []>} : vector<16x128xbf16>, vector<128x128xbf16>, vector<16x128xf32> -> vector<16x128xf32>
    %76 = arith.addf %71, %75 : vector<16x128xf32>
    %c0_42 = arith.constant 0 : index
    %c0_43 = arith.constant 0 : index
    %77 = vector.load %arg5[%c0_42, %c0_43] : memref<1x128xf32, #tpu.memory_space<vmem>>, vector<1x128xf32>
    %78 = vector.broadcast %77 : vector<1x128xf32> to vector<16x128xf32>
    %79 = arith.addf %76, %78 : vector<16x128xf32>
    %c0_44 = arith.constant 0 : index
    %c0_45 = arith.constant 0 : index
    %80 = vector.load %arg6[%c0_44, %c0_45] : memref<16x128xf32, #tpu.memory_space<vmem>>, vector<16x128xf32>
    tpu.vector_store %arg6[%c0_44, %c0_45], %79 {strides = array<i32>} : memref<16x128xf32, #tpu.memory_space<vmem>>, vector<16x128xf32>,
    return
  }
}

</mosaic_0001>

<bundles_post_ra>
// kernel: tpu_custom_call.1
= control target key start
LH: loop header
LB: loop body
LE: loop exit
PB: predicated region body
PF: predicated region fallthrough
CT: control target
= control target key end

     0   :  { %11 = vsyncpa [#allocation3], 0  ;;  %s1743_s0 = inlined_call_operand.hbm [shape: bf16[16,16], index: 0, kind: input, shape index: {}]   ;;  %s1744_s1 = inlined_call_operand.hbm [shape: bf16[16,128], index: 1, kind: input, shape index: {}]   ;;  %s1745_s2 = inlined_call_operand.hbm [shape: bf16[1024,128], index: 2, kind: input, shape index: {}]   ;;  %s1746_s3 = inlined_call_operand.vmem [shape: f32[1,128], index: 3, kind: input, shape index: {}]   ;;  %s1747_s4 = inlined_call_operand.hbm [shape: bf16[256,128], index: 4, kind: input, shape index: {}]   ;;  %s1748_s5 = inlined_call_operand.vmem [shape: f32[1,128], index: 5, kind: input, shape index: {}]   ;;  %s1749_s6 = inlined_call_operand.hbm [shape: f32[16,128], index: 6, kind: output, shape index: {}]  }
   0x1   :  { %12 = vsyncpa [#allocation6], 0 }
   0x2   :  { %13 = vsyncpa [#allocation9], 0 }
   0x3   :  { %14 = vsyncpa [#allocation4], 0  ;;  %s32_s23 = sshll.u32 %s1744_s1, 4  ;;  %s1640_s24 = smov [#allocation5]   ;;  %s33_s23 = int_to_ptr.hbm [resolvable:$true] %s32_s23 }
   0x4   :  { %s34_s25 = sshll.u32 %s1640_s24, 4  ;;  %s19_s28 = sshll.u32 %s1743_s0, 4  ;;  %s35_s25 = int_to_ptr.vmem [resolvable:$true] %s34_s25  ;;  %s20_s28 = int_to_ptr.hbm [resolvable:$true] %s19_s28 }
   0x5   :  { %s1641_s29 = smov 64   ;;  %s1642_s30 = smov 4  }
   0x6   :  { %40 = dma.hbm_to_vmem [thread:$0]  %s33_s23, 128, %s35_s25, [#allocation6], %s1641_s29, %s1641_s29, %s1642_s30  }
   0x7   :  { %s1643_s7 = smov [#allocation2]   ;;  %s45_s11 = sshll.u32 %s1745_s2, 4  ;;  %s46_s11 = int_to_ptr.hbm [resolvable:$true] %s45_s11 }
   0x8   :  { %s21_s8 = sshll.u32 %s1643_s7, 4  ;;  %s60_s13 = sshll.u32 %s1747_s4, 4  ;;  %s22_s8 = int_to_ptr.vmem [resolvable:$true] %s21_s8  ;;  %s61_s13 = int_to_ptr.hbm [resolvable:$true] %s60_s13 }
   0x9   :  { %27 = dma.hbm_to_vmem [thread:$0]  %s20_s28, 128, %s22_s8, [#allocation3], %s1641_s29, %s1641_s29, %s1642_s30  }
   0xa   :  { %s1644_s14 = smov [#allocation7]   ;;  %s1645_s0 = smov [#allocation8]  }
   0xb   :  { %s47_s15 = sshll.u32 %s1644_s14, 4  ;;  %s62_s16 = sshll.u32 %s1645_s0, 4  ;;  %s48_s15 = int_to_ptr.vmem [resolvable:$true] %s47_s15  ;;  %s63_s16 = int_to_ptr.vmem [resolvable:$true] %s62_s16 }
   0xc   :  { %53 = dma.hbm_to_vmem [thread:$0]  %s46_s11, 8192, %s48_s15, [#allocation6], %s1641_s29, %s1641_s29, %s1642_s30  }
   0xd   :  { %68 = dma.hbm_to_vmem [thread:$0]  %s61_s13, 2048, %s63_s16, [#allocation9], %s1641_s29, %s1641_s29, %s1642_s30  }
   0xe   :  { %1632 = dma.done.wait [#allocation3], 128  }
   0xf   :  { %1633 = vsyncadd [#allocation3], 4294967168 }
  0x10   :  { %1634 = dma.done.wait [#allocation6], 8320  }
  0x11   :  { %1635 = vsyncadd [#allocation6], 4294958976 }
  0x12   :  { %1636 = dma.done.wait [#allocation9], 2048  }
  0x13   :  { %1637 = vsyncadd [#allocation9], 4294965248  ;;  %v1420_v0 = vld [vmem:[#allocation5] sm:$0xff]  ;;  %v1696_v2 = vld [vmem:[#allocation2] sm:$0xff]  ;;  %vm121_vm0 = vcmask 130048   ;;  %s1646_s18 = smov [#allocation10]  }
  0x14   :  { %v1428_v1 = vld [vmem:[#allocation7 + $0x38] sm:$0xff]  ;;  %132 = vmatpush.bf16.msra.mxu0 %v1420_v0  ;;  %v1427_v4 = vld [vmem:[#allocation7 + $0x30] sm:$0xff]  ;;  %v1426_v6 = vld [vmem:[#allocation7 + $0x28] sm:$0xff]  ;;  %s1066_s19 = sshll.u32 %s1646_s18, 4  ;;  %s1068_s22 = sshll.u32 %s1749_s6, 4  ;;  %s1067_s19 = int_to_ptr.vmem [resolvable:$true] %s1066_s19  ;;  %s1069_s22 = int_to_ptr.hbm [resolvable:$true] %s1068_s22 }
  0x15   :  { %v1436_v3 = vld [vmem:[#allocation7 + $0x78] sm:$0xff]  ;;  %266 = vmatpush.bf16.msra.mxu2 %v1428_v1  ;;  %v1435_v5 = vld [vmem:[#allocation7 + $0x70] sm:$0xff]  ;;  %v1434_v7 = vld [vmem:[#allocation7 + $0x68] sm:$0xff]  ;;  %s1647_s23 = smov 128   ;;  %s1648_s24 = smov 8  }
  0x16   :  { %204 = vmatpush.bf16.msra.mxu1 %v1436_v3  ;;  %v1425_v8 = vld [vmem:[#allocation7 + $0x20] sm:$0xff]  ;;  %v1424_v10 = vld [vmem:[#allocation7 + $0x18] sm:$0xff]  ;;  %v1423_v12 = vld [vmem:[#allocation7 + $0x10] sm:$0xff] }
  0x17   :  { %1091 = vmatmul.msk.bf16.vlgmr.msra.gmra.mxu0 %vm121_vm0, %v1696_v2  ;;  %v1433_v9 = vld [vmem:[#allocation7 + $0x60] sm:$0xff]  ;;  %v1432_v11 = vld [vmem:[#allocation7 + $0x58] sm:$0xff]  ;;  %v1422_v13 = vld [vmem:[#allocation7 + $0x8] sm:$0xff] }
  0x18   :  { %v1431_v14 = vld [vmem:[#allocation7 + $0x50] sm:$0xff]  ;;  %v1421_v15 = vld [vmem:[#allocation7] sm:$0xff]  ;;  %v1430_v16 = vld [vmem:[#allocation7 + $0x48] sm:$0xff] }
  0x19   :  { %267 = vmatpush.bf16.msra.mxu2 %v1427_v4  ;;  %v1429_v17 = vld [vmem:[#allocation7 + $0x40] sm:$0xff]  ;;  %v1444_v21 = vld [vmem:[#allocation7 + $0xb8] sm:$0xff]  ;;  %v1443_v22 = vld [vmem:[#allocation7 + $0xb0] sm:$0xff] }
  0x1a   :  { %205 = vmatpush.bf16.msra.mxu1 %v1435_v5  ;;  %363 = vmatpush.bf16.msrb.mxu0 %v1444_v21  ;;  %v1442_v23 = vld [vmem:[#allocation7 + $0xa8] sm:$0xff]  ;;  %v1441_v24 = vld [vmem:[#allocation7 + $0xa0] sm:$0xff]  ;;  %v1440_v25 = vld [vmem:[#allocation7 + $0x98] sm:$0xff] }
  0x1b   :  { %v1439_v26 = vld [vmem:[#allocation7 + $0x90] sm:$0xff]  ;;  %v1438_v27 = vld [vmem:[#allocation7 + $0x88] sm:$0xff]  ;;  %v1437_v28 = vld [vmem:[#allocation7 + $0x80] sm:$0xff] }
  0x1c   :  { %v90_v34 = vld [vmem:[#allocation5] sm:$0xff]   ;;  %v1451_v44 = vld [vmem:[#allocation7 + $0xf0] sm:$0xff]  ;;  %v1450_v45 = vld [vmem:[#allocation7 + $0xe8] sm:$0xff] }
  0x1d   :  { %268 = vmatpush.bf16.msra.mxu2 %v1426_v6  ;;  %v108_v35 = vunpack.c.l.bf16 %v90_v34  ;;  %v109_v37 = vunpack.c.h.bf16 %v90_v34  ;;  %v1452_v42 = vld [vmem:[#allocation7 + $0xf8] sm:$0xff]  ;;  %v1449_v46 = vld [vmem:[#allocation7 + $0xe0] sm:$0xff]  ;;  %v1447_v48 = vld [vmem:[#allocation7 + $0xd0] sm:$0xff] }
  0x1e   :  { %206 = vmatpush.bf16.msra.mxu1 %v1434_v7  ;;  %364 = vmatpush.bf16.msrb.mxu0 %v1443_v22  ;;  %v1448_v47 = vld [vmem:[#allocation7 + $0xd8] sm:$0xff]  ;;  %v1446_v49 = vld [vmem:[#allocation7 + $0xc8] sm:$0xff]  ;;  %v1445_v50 = vld [vmem:[#allocation7 + $0xc0] sm:$0xff] }
  0x1f   :  { %v1460_v51 = vld [vmem:[#allocation7 + $0x138] sm:$0xff]  ;;  %v1459_v52 = vld [vmem:[#allocation7 + $0x130] sm:$0xff]  ;;  %v1458_v55 = vld [vmem:[#allocation7 + $0x128] sm:$0xff] }
  0x20   :  { %v1457_v56 = vld [vmem:[#allocation7 + $0x120] sm:$0xff]  ;;  %v1455_v1 = vld [vmem:[#allocation7 + $0x110] sm:$0xff]  ;;  %v1454_v3 = vld [vmem:[#allocation7 + $0x108] sm:$0xff] }
  0x21   :  { %269 = vmatpush.bf16.msra.mxu2 %v1425_v8  ;;  %v1453_v4 = vld [vmem:[#allocation7 + $0x100] sm:$0xff]  ;;  %v1468_v5 = vld [vmem:[#allocation7 + $0x178] sm:$0xff]  ;;  %v1467_v6 = vld [vmem:[#allocation7 + $0x170] sm:$0xff] }
  0x22   :  { %207 = vmatpush.bf16.msra.mxu1 %v1433_v9  ;;  %365 = vmatpush.bf16.msrb.mxu0 %v1442_v23  ;;  %v1466_v7 = vld [vmem:[#allocation7 + $0x168] sm:$0xff]  ;;  %v1465_v8 = vld [vmem:[#allocation7 + $0x160] sm:$0xff]  ;;  %v1475_v21 = vld [vmem:[#allocation7 + $0x1b0] sm:$0xff] }
  0x23   :  { %v1474_v23 = vld [vmem:[#allocation7 + $0x1a8] sm:$0xff] }
  0x25   :  { %270 = vmatpush.bf16.msra.mxu2 %v1424_v10 }
  0x26   :  { %208 = vmatpush.bf16.msra.mxu1 %v1432_v11  ;;  %366 = vmatpush.bf16.msrb.mxu0 %v1441_v24 }
  0x29   :  { %271 = vmatpush.bf16.msra.mxu2 %v1423_v12 }
  0x2a   :  { %209 = vmatpush.bf16.msra.mxu1 %v1431_v14  ;;  %367 = vmatpush.bf16.msrb.mxu0 %v1440_v25  ;;  %v1473_v25 = vld [vmem:[#allocation7 + $0x1a0] sm:$0xff] }
  0x2d   :  { %272 = vmatpush.bf16.msra.mxu2 %v1422_v13 }
  0x2e   :  { %210 = vmatpush.bf16.msra.mxu1 %v1430_v16  ;;  %368 = vmatpush.bf16.msrb.mxu0 %v1439_v26  ;;  %v1464_v16 = vld [vmem:[#allocation7 + $0x158] sm:$0xff] }
  0x31   :  { %273 = vmatpush.bf16.msra.mxu2 %v1421_v15 }
  0x32   :  { %211 = vmatpush.bf16.msra.mxu1 %v1429_v17  ;;  %369 = vmatpush.bf16.msrb.mxu0 %v1438_v27  ;;  %v1463_v17 = vld [vmem:[#allocation7 + $0x150] sm:$0xff] }
  0x34   :  { %274 = vmatmul.bf16.vlgmr.msra.gmra.mxu2 %v1420_v0  ;;  %v1456_v0 = vld [vmem:[#allocation7 + $0x118] sm:$0xff] }
  0x35   :  { %561 = vmatpush.bf16.msrb.mxu2 %v1460_v51 }
  0x36   :  { %370 = vmatpush.bf16.msrb.mxu0 %v1437_v28 }
  0x39   :  { %562 = vmatpush.bf16.msrb.mxu2 %v1459_v52 }
  0x3d   :  { %563 = vmatpush.bf16.msrb.mxu2 %v1458_v55  ;;  %v1478_v55 = vld [vmem:[#allocation7 + $0x1c8] sm:$0xff] }
  0x41   :  { %564 = vmatpush.bf16.msrb.mxu2 %v1457_v56  ;;  %v1477_v56 = vld [vmem:[#allocation7 + $0x1c0] sm:$0xff] }
  0x45   :  { %565 = vmatpush.bf16.msrb.mxu2 %v1456_v0 }
  0x49   :  { %566 = vmatpush.bf16.msrb.mxu2 %v1455_v1 }
  0x4d   :  { %567 = vmatpush.bf16.msrb.mxu2 %v1454_v3 }
  0x51   :  { %568 = vmatpush.bf16.msrb.mxu2 %v1453_v4 }
  0x94   :  { %v1700_v18 = vpop.f32.mrf.mxu0 }
  0x9c   :  { %v1702_v19 = vpop.f32.mrf.mxu0 }
  0x9d   :  { %v139_v20 = vpack.c.bf16 %v1702_v19, %v1700_v18 }
  0x9f   :  { %212 = vmatmul.bf16.vlgmr.msra.gmra.mxu1 %v139_v20 }
  0xa0   :  { %287 = vmatpush.bf16.msrb.mxu1 %v139_v20  ;;  %v1476_v20 = vld [vmem:[#allocation7 + $0x1b8] sm:$0xff] }
  0xaf   :  { %1156 = vmatmul.msk.bf16.vlgmr.msrb.gmra.mxu1 %vm121_vm0, %v1696_v2 }
  0xb7   :  { %v275_v29 = vpop.f32.mrf.mxu2 }
  0xbf   :  { %v1720_v24 = vpop.f32.mrf.mxu2 }
 0x11c   :  { %v213_v30 = vpop.f32.mrf.mxu1 }
 0x11d   :  { %v276_v31 = vadd.f32 %v275_v29, %v213_v30 }
 0x124   :  { %v1708_v32 = vpop.f32.mrf.mxu1 }
 0x12c   :  { %v289_v33 = vpop.f32.mrf.mxu1 }
 0x12d   :  { %v294_v36 = vmul.f32 2.0, %v289_v33 }
 0x12f   :  { %v296_v40 = vsub.f32 %v294_v36, %v108_v35 }
 0x134   :  { %v291_v38 = vpop.f32.mrf.mxu1 }
 0x135   :  { %v295_v39 = vmul.f32 2.0, %v291_v38  ;;  %v1472_v38 = vld [vmem:[#allocation7 + $0x198] sm:$0xff] }
 0x137   :  { %v297_v41 = vsub.f32 %v295_v39, %v109_v37  ;;  %v1471_v39 = vld [vmem:[#allocation7 + $0x190] sm:$0xff] }
 0x139   :  { %v298_v43 = vpack.c.bf16 %v297_v41, %v296_v40 }
 0x13b   :  { %371 = vmatmul.bf16.vlgmr.msrb.gmra.mxu0 %v298_v43  ;;  %386 = vmatpush.bf16.msra.mxu3 %v298_v43  ;;  %v1483_v43 = vld [vmem:[#allocation7 + $0x1f0] sm:$0xff] }
 0x13e   :  { %1189 = vmatmul.msk.bf16.vlgmr.msra.gmra.mxu3 %vm121_vm0, %v1696_v2 }
 0x13f   :  { %462 = vmatpush.bf16.msrb.mxu3 %v1452_v42  ;;  %v1484_v42 = vld [vmem:[#allocation7 + $0x1f8] sm:$0xff] }
 0x143   :  { %463 = vmatpush.bf16.msrb.mxu3 %v1451_v44  ;;  %v1482_v44 = vld [vmem:[#allocation7 + $0x1e8] sm:$0xff] }
 0x147   :  { %464 = vmatpush.bf16.msrb.mxu3 %v1450_v45  ;;  %v1481_v45 = vld [vmem:[#allocation7 + $0x1e0] sm:$0xff] }
 0x14b   :  { %465 = vmatpush.bf16.msrb.mxu3 %v1449_v46 }
 0x14f   :  { %466 = vmatpush.bf16.msrb.mxu3 %v1448_v47 }
 0x153   :  { %467 = vmatpush.bf16.msrb.mxu3 %v1447_v48 }
 0x157   :  { %468 = vmatpush.bf16.msrb.mxu3 %v1446_v49 }
 0x15b   :  { %469 = vmatpush.bf16.msrb.mxu3 %v1445_v50 }
 0x15f   :  { %759 = vmatpush.bf16.msra.mxu3 %v1476_v20 }
 0x163   :  { %760 = vmatpush.bf16.msra.mxu3 %v1475_v21 }
 0x167   :  { %761 = vmatpush.bf16.msra.mxu3 %v1474_v23 }
 0x16b   :  { %762 = vmatpush.bf16.msra.mxu3 %v1473_v25  ;;  %v1496_v25 = vld [vmem:[#allocation8 + $0x58] sm:$0xff] }
 0x16f   :  { %763 = vmatpush.bf16.msra.mxu3 %v1472_v38  ;;  %v1495_v38 = vld [vmem:[#allocation8 + $0x50] sm:$0xff] }
 0x173   :  { %764 = vmatpush.bf16.msra.mxu3 %v1471_v39  ;;  %v1494_v39 = vld [vmem:[#allocation8 + $0x48] sm:$0xff] }
 0x1b8   :  { %v372_v53 = vpop.f32.mrf.mxu0 }
 0x1b9   :  { %v377_v54 = vadd.f32 %v372_v53, %v276_v31  ;;  %v1480_v53 = vld [vmem:[#allocation7 + $0x1d8] sm:$0xff] }
 0x1c0   :  { %v1718_v22 = vpop.f32.mrf.mxu0 }
 0x1c1   :  { %v388_v57 = vpop.f32.mrf.mxu3 }
 0x1c2   :  { %v393_v58 = vmul.f32 2.0, %v388_v57  ;;  %v1492_v57 = vld [vmem:[#allocation8 + $0x38] sm:$0xff] }
 0x1c4   :  { %v395_v61 = vsub.f32 %v393_v58, %v1700_v18  ;;  %v1462_v18 = vld [vmem:[#allocation7 + $0x148] sm:$0xff]  ;;  %v1491_v58 = vld [vmem:[#allocation8 + $0x30] sm:$0xff] }
 0x1c9   :  { %v390_v59 = vpop.f32.mrf.mxu3 }
 0x1ca   :  { %v394_v60 = vmul.f32 2.0, %v390_v59  ;;  %v1490_v59 = vld [vmem:[#allocation8 + $0x28] sm:$0xff] }
 0x1cc   :  { %v396_v62 = vsub.f32 %v394_v60, %v1702_v19  ;;  %v1461_v19 = vld [vmem:[#allocation7 + $0x140] sm:$0xff] }
 0x1ce   :  { %v397_v63 = vpack.c.bf16 %v396_v62, %v395_v61 }
 0x1d0   :  { %470 = vmatmul.bf16.vlgmr.msrb.gmra.mxu3 %v397_v63  ;;  %485 = vmatpush.bf16.msra.mxu1 %v397_v63 }
 0x1d3   :  { %1222 = vmatmul.msk.bf16.vlgmr.msra.gmra.mxu1 %vm121_vm0, %v1696_v2 }
 0x1d4   :  { %660 = vmatpush.bf16.msrb.mxu1 %v1468_v5 }
 0x1d8   :  { %661 = vmatpush.bf16.msrb.mxu1 %v1467_v6  ;;  %v1488_v6 = vld [vmem:[#allocation8 + $0x18] sm:$0xff] }
 0x1dc   :  { %662 = vmatpush.bf16.msrb.mxu1 %v1466_v7  ;;  %v1487_v7 = vld [vmem:[#allocation8 + $0x10] sm:$0xff] }
 0x1e0   :  { %663 = vmatpush.bf16.msrb.mxu1 %v1465_v8  ;;  %v1486_v8 = vld [vmem:[#allocation8 + $0x8] sm:$0xff] }
 0x1e4   :  { %664 = vmatpush.bf16.msrb.mxu1 %v1464_v16  ;;  %v278_v16 = vadd.f32 %v1720_v24, %v1708_v32  ;;  %v1510_v32 = vld [vmem:[%s1746_s3] ss:$0 sm:$0xff] }
 0x1e8   :  { %665 = vmatpush.bf16.msrb.mxu1 %v1463_v17  ;;  %v1497_v17 = vld [vmem:[#allocation8 + $0x60] sm:$0xff] }
 0x1ec   :  { %666 = vmatpush.bf16.msrb.mxu1 %v1462_v18  ;;  %v378_v18 = vadd.f32 %v1718_v22, %v278_v16 }
 0x1f0   :  { %667 = vmatpush.bf16.msrb.mxu1 %v1461_v19 }
 0x250   :  { %v487_v9 = vpop.f32.mrf.mxu1 }
 0x251   :  { %v492_v10 = vmul.f32 2.0, %v487_v9  ;;  %v1485_v9 = vld [vmem:[#allocation8] sm:$0xff] }
 0x253   :  { %v494_v13 = vsub.f32 %v492_v10, %v296_v40  ;;  %v471_v26 = vpop.f32.mrf.mxu3  ;;  %v1470_v40 = vld [vmem:[#allocation7 + $0x188] sm:$0xff] }
 0x254   :  { %v476_v28 = vadd.f32 %v471_v26, %v377_v54  ;;  %765 = vmatpush.bf16.msra.mxu3 %v1470_v40  ;;  %v1479_v54 = vld [vmem:[#allocation7 + $0x1d0] sm:$0xff]  ;;  %v1493_v40 = vld [vmem:[#allocation8 + $0x40] sm:$0xff] }
 0x258   :  { %v489_v11 = vpop.f32.mrf.mxu1 }
 0x259   :  { %v493_v12 = vmul.f32 2.0, %v489_v11  ;;  %v1500_v11 = vld [vmem:[#allocation8 + $0x78] sm:$0xff] }
 0x25b   :  { %v495_v14 = vsub.f32 %v493_v12, %v297_v41  ;;  %v1469_v41 = vld [vmem:[#allocation7 + $0x180] sm:$0xff]  ;;  %v473_v10 = vpop.f32.mrf.mxu3  ;;  %v1499_v12 = vld [vmem:[#allocation8 + $0x70] sm:$0xff] }
 0x25c   :  { %766 = vmatpush.bf16.msra.mxu3 %v1469_v41  ;;  %v477_v20 = vadd.f32 %v473_v10, %v378_v18 }
 0x25d   :  { %v496_v15 = vpack.c.bf16 %v495_v14, %v494_v13 }
 0x25f   :  { %569 = vmatmul.bf16.vlgmr.msrb.gmra.mxu2 %v496_v15  ;;  %584 = vmatpush.bf16.msra.mxu0 %v496_v15  ;;  %v1498_v15 = vld [vmem:[#allocation8 + $0x68] sm:$0xff] }
 0x260   :  { %1040 = vmatpush.bf16.msrb.mxu3 %v1492_v57 }
 0x262   :  { %1255 = vmatmul.msk.bf16.vlgmr.msra.gmra.mxu0 %vm121_vm0, %v1696_v2 }
 0x264   :  { %1041 = vmatpush.bf16.msrb.mxu3 %v1491_v58 }
 0x268   :  { %1042 = vmatpush.bf16.msrb.mxu3 %v1490_v59 }
 0x2df   :  { %v586_v27 = vpop.f32.mrf.mxu0 }
 0x2e0   :  { %v591_v31 = vmul.f32 2.0, %v586_v27 }
 0x2e2   :  { %v570_v29 = vpop.f32.mrf.mxu2  ;;  %v593_v35 = vsub.f32 %v591_v31, %v395_v61  ;;  %v1489_v61 = vld [vmem:[#allocation8 + $0x20] sm:$0xff] }
 0x2e3   :  { %v1722_v30 = vadd.f32 %v570_v29, %v476_v28  ;;  %1043 = vmatpush.bf16.msrb.mxu3 %v1489_v61 }
 0x2e7   :  { %v588_v33 = vpop.f32.mrf.mxu0  ;;  %1044 = vmatpush.bf16.msrb.mxu3 %v1488_v6 }
 0x2e8   :  { %v592_v34 = vmul.f32 2.0, %v588_v33 }
 0x2ea   :  { %v594_v36 = vsub.f32 %v592_v34, %v396_v62  ;;  %v572_v60 = vpop.f32.mrf.mxu2 }
 0x2eb   :  { %1045 = vmatpush.bf16.msrb.mxu3 %v1487_v7  ;;  %v576_v26 = vadd.f32 %v572_v60, %v477_v20 }
 0x2ec   :  { %v595_v37 = vpack.c.bf16 %v594_v36, %v593_v35 }
 0x2ee   :  { %668 = vmatmul.bf16.vlgmr.msrb.gmra.mxu1 %v595_v37  ;;  %683 = vmatpush.bf16.msrb.mxu0 %v595_v37 }
 0x2ef   :  { %1046 = vmatpush.bf16.msrb.mxu3 %v1486_v8 }
 0x2f1   :  { %1288 = vmatmul.msk.bf16.vlgmr.msrb.gmra.mxu0 %vm121_vm0, %v1696_v2 }
 0x2f2   :  { %858 = vmatpush.bf16.msra.mxu0 %v1484_v42 }
 0x2f3   :  { %1047 = vmatpush.bf16.msrb.mxu3 %v1485_v9 }
 0x2f6   :  { %859 = vmatpush.bf16.msra.mxu0 %v1483_v43 }
 0x2fa   :  { %860 = vmatpush.bf16.msra.mxu0 %v1482_v44 }
 0x2fe   :  { %861 = vmatpush.bf16.msra.mxu0 %v1481_v45  ;;  %v1511_v45 = vld [vmem:[%s1748_s5] ss:$0 sm:$0xff] }
 0x302   :  { %862 = vmatpush.bf16.msra.mxu0 %v1480_v53 }
 0x306   :  { %863 = vmatpush.bf16.msra.mxu0 %v1479_v54 }
 0x30a   :  { %864 = vmatpush.bf16.msra.mxu0 %v1478_v55 }
 0x30e   :  { %865 = vmatpush.bf16.msra.mxu0 %v1477_v56 }
 0x36e   :  { %v685_v46 = vpop.f32.mrf.mxu0 }
 0x36f   :  { %v690_v47 = vmul.f32 2.0, %v685_v46 }
 0x371   :  { %v692_v50 = vsub.f32 %v690_v47, %v494_v13  ;;  %v669_v13 = vpop.f32.mrf.mxu1 }
 0x372   :  { %v674_v21 = vadd.f32 %v669_v13, %v1722_v30 }
 0x376   :  { %v687_v48 = vpop.f32.mrf.mxu0 }
 0x377   :  { %v691_v49 = vmul.f32 2.0, %v687_v48 }
 0x379   :  { %v693_v51 = vsub.f32 %v691_v49, %v495_v14  ;;  %v671_v23 = vpop.f32.mrf.mxu1 }
 0x37a   :  { %v675_v29 = vadd.f32 %v671_v23, %v576_v26 }
 0x37b   :  { %v694_v52 = vpack.c.bf16 %v693_v51, %v692_v50 }
 0x37d   :  { %767 = vmatmul.bf16.vlgmr.msra.gmra.mxu3 %v694_v52  ;;  %782 = vmatpush.bf16.msra.mxu2 %v694_v52 }
 0x380   :  { %1321 = vmatmul.msk.bf16.vlgmr.msra.gmra.mxu2 %vm121_vm0, %v1696_v2 }
 0x381   :  { %978 = vmatpush.bf16.msrb.mxu2 %v1500_v11 }
 0x385   :  { %979 = vmatpush.bf16.msrb.mxu2 %v1499_v12 }
 0x389   :  { %980 = vmatpush.bf16.msrb.mxu2 %v1498_v15 }
 0x38d   :  { %981 = vmatpush.bf16.msrb.mxu2 %v1497_v17 }
 0x391   :  { %982 = vmatpush.bf16.msrb.mxu2 %v1496_v25 }
 0x395   :  { %983 = vmatpush.bf16.msrb.mxu2 %v1495_v38 }
 0x399   :  { %984 = vmatpush.bf16.msrb.mxu2 %v1494_v39 }
 0x39d   :  { %985 = vmatpush.bf16.msrb.mxu2 %v1493_v40 }
 0x400   :  { %v768_v14 = vpop.f32.mrf.mxu3 }
 0x401   :  { %v773_v27 = vadd.f32 %v768_v14, %v674_v21 }
 0x403   :  { %v784_v62 = vpop.f32.mrf.mxu2 }
 0x404   :  { %v789_v63 = vmul.f32 2.0, %v784_v62 }
 0x406   :  { %v791_v3 = vsub.f32 %v789_v63, %v593_v35 }
 0x408   :  { %v770_v28 = vpop.f32.mrf.mxu3 }
 0x409   :  { %v774_v24 = vadd.f32 %v770_v28, %v675_v29 }
 0x40b   :  { %v786_v0 = vpop.f32.mrf.mxu2 }
 0x40c   :  { %v790_v1 = vmul.f32 2.0, %v786_v0 }
 0x40e   :  { %v792_v4 = vsub.f32 %v790_v1, %v594_v36 }
 0x410   :  { %v793_v5 = vpack.c.bf16 %v792_v4, %v791_v3 }
 0x412   :  { %866 = vmatmul.bf16.vlgmr.msra.gmra.mxu0 %v793_v5 }
 0x48f   :  { %v867_v19 = vpop.f32.mrf.mxu0 }
 0x490   :  { %v872_v31 = vadd.f32 %v867_v19, %v773_v27 }
 0x492   :  { %v878_v22 = vadd.f32 %v1510_v32, %v872_v31 }
 0x494   :  { %v880_v36 = vmax.f32 %v878_v22, 0.0 }
 0x497   :  { %v869_v33 = vpop.f32.mrf.mxu0 }
 0x498   :  { %v873_v34 = vadd.f32 %v869_v33, %v774_v24 }
 0x49a   :  { %v879_v35 = vadd.f32 %v1510_v32, %v873_v34 }
 0x49c   :  { %v881_v30 = vmax.f32 %v879_v35, 0.0 }
 0x49e   :  { %v882_v37 = vpack.c.bf16 %v881_v30, %v880_v36 }
 0x4a0   :  { %906 = vmatpush.bf16.msra.mxu1 %v882_v37  ;;  %1048 = vmatmul.bf16.vlgmr.msrb.gmra.mxu3 %v882_v37 }
 0x4a3   :  { %1354 = vmatmul.msk.bf16.vlgmr.msra.gmra.mxu1 %vm121_vm0, %v1696_v2 }
 0x520   :  { %v908_v41 = vpop.f32.mrf.mxu1 }
 0x523   :  { %v1049_v44 = vpop.f32.mrf.mxu3 }
 0x528   :  { %v910_v42 = vpop.f32.mrf.mxu1 }
 0x529   :  { %v913_v43 = vpack.c.bf16 %v910_v42, %v908_v41 }
 0x52b   :  { %986 = vmatmul.bf16.vlgmr.msrb.gmra.mxu2 %v913_v43  ;;  %v1051_v2 = vpop.f32.mrf.mxu3 }
 0x5ae   :  { %v987_v46 = vpop.f32.mrf.mxu2 }
 0x5af   :  { %v1050_v47 = vadd.f32 %v1049_v44, %v987_v46 }
 0x5b1   :  { %v1058_v48 = vadd.f32 %v1511_v45, %v1050_v47 }
 0x5b3   :  { %1060 = vst [vmem:[#allocation10] sm:$0xff] %v1058_v48 }
 0x5b6   :  { %v989_v49 = vpop.f32.mrf.mxu2 }
 0x5b7   :  { %v1052_v50 = vadd.f32 %v1051_v2, %v989_v49 }
 0x5b9   :  { %v1059_v51 = vadd.f32 %v1511_v45, %v1052_v50 }
 0x5bb   :  { %1061 = vst [vmem:[#allocation10 + $0x8] sm:$0xff] %v1059_v51 }
 0x5bc   :  { %1074 = dma.vmem_to_hbm [thread:$0]  %s1067_s19, 256, %s1069_s22, [#allocation4], %s1647_s23, %s1647_s23, %s1648_s24  }
 0x5bd   :  { %1638 = dma.done.wait [#allocation4], 256  }
 0x5be   :  { %1639 = vsyncadd [#allocation4], 4294967040 }
 0x5bf   :  { %1079 = vsyncpa [#allocation3], 1 }
 0x5c0   :  { %1080 = vsyncpa [#allocation6], 1 }
 0x5c1   :  { %1081 = vsyncpa [#allocation9], 1 }
 0x5c2   :  { %1082 = vsyncpa [#allocation4], 1 }

</bundles_post_ra>
